<compile_context>
chip_gen: v5e
topology: v5e:2x2
jax: 0.10.0
libtpu: 0.0.40
codegen_flags: <defaults>
</compile_context>

<pallas_src>
import math
from itertools import permutations

import numpy as np
import jax
import jax.numpy as jnp
from jax.experimental import pallas as pl
from jax.experimental.pallas import tpu as pltpu

_LOG_2PI = math.log(2.0 * math.pi)


def _dot_t(a, b):
    """a @ b.T on the MXU (contract the last dim of both operands)."""
    return jax.lax.dot_general(
        a, b, (((1,), (1,)), ((), ())), preferred_element_type=jnp.float32)


# ----------------------------------------------------------------------------
# Pallas kernel (single grid step, everything VMEM resident):
#   m_ref[j, i] = Independent(Normal(centroid_i, cov_net(centroid_i)), 1)
#                    .log_prob(local_prompt_flat[j])   -> (n_clients*n_local, n_global)
#   b_ref[0, i] = log  p_i   (bernoulli_net)           -> (2, n_global)
#   b_ref[1, i] = log (1-p_i)
# These are exactly the loop-invariant pieces of prompt_likelihood /
# z_likelihood's cost matrices; m2 = n_local*(c*logp + (1-c)*log1mp) is host-side.
# ----------------------------------------------------------------------------
def _agg_kernel(x_ref, cent_ref, w1_ref, b1_ref, w2_ref, b2_ref,
                wb1_ref, bb1_ref, wb2t_ref, bb2_ref, m_ref, b_ref):
    x = x_ref[...]                    # (N, D)  all clients' local prompts, flat
    cent = cent_ref[...]              # (G, D)  global centroids
    D = x.shape[1]

    # ---- cov_net: Linear -> ReLU -> Linear -> Sigmoid (output = Normal scale)
    h = jnp.maximum(
        jnp.dot(cent, w1_ref[...], preferred_element_type=jnp.float32) + b1_ref[...],
        0.0)                                                              # (G, H)
    y = jnp.dot(h, w2_ref[...], preferred_element_type=jnp.float32) + b2_ref[...]  # (G, D)
    # sigma = sigmoid(y); work in log-space: log(sigmoid(y)) = -softplus(-y).
    # Floor prevents inv_var overflow if the sigmoid saturates toward 0.
    log_sigma = jnp.maximum(-jax.nn.softplus(-y), -40.0)                  # (G, D)
    inv_var = jnp.exp(-2.0 * log_sigma)                                   # 1/sigma^2 (EUP)

    # Gaussian log-prob, produced directly in (N, G) so n_global is lane-dense:
    #   m[j,i] = -0.5 * sum_d (x[j,d]-cent[i,d])^2 * inv_var[i,d]
    #            - sum_d log_sigma[i,d] - 0.5*D*log(2*pi)
    term_xx = _dot_t(x * x, inv_var)                                      # (N, G)
    term_xc = _dot_t(x, inv_var * cent)                                   # (N, G)
    per_d = -0.5 * inv_var * cent * cent - log_sigma                      # (G, D)
    term_row = _dot_t(jnp.ones((1, D), jnp.float32), per_d)               # (1, G)
    m_ref[...] = (-0.5 * term_xx + term_xc + term_row
                  - 0.5 * float(D) * _LOG_2PI)

    # ---- bernoulli_net: Linear -> ReLU -> Linear -> Sigmoid, kept in logit
    # space (wb2 passed pre-transposed as (1, H) so the result is a lane row).
    hb = jnp.maximum(
        jnp.dot(cent, wb1_ref[...], preferred_element_type=jnp.float32) + bb1_ref[...],
        0.0)                                                              # (G, H)
    yb = _dot_t(wb2t_ref[...], hb) + bb2_ref[...]                         # (1, G)
    b_ref[0:1, :] = -jax.nn.softplus(-yb)                                 # log p
    b_ref[1:2, :] = -jax.nn.softplus(yb)                                  # log (1-p)


@jax.jit
def compute_likelihood_tables(local_prompts_flat, centroids, params):
    """One pallas_call producing all loop-invariant likelihood tables.

    Returns:
      m_flat: (n_clients*n_local, n_global)  Gaussian log-prob, transposed layout.
      b_tab:  (2, n_global)                  rows = [log p, log(1-p)].
    """
    N, D = local_prompts_flat.shape
    G = centroids.shape[0]
    w1, b1, w2, b2, wb1, bb1, wb2, bb2 = params
    wb2t = jnp.transpose(wb2)                                             # (1, H)

    def full(arr):
        # Full-array block (bypasses the (8,128) tile constraint and stays
        # VMEM-resident for the single grid step).
        return pl.BlockSpec(arr.shape, lambda i: (0,) * arr.ndim)

    grid_spec = pltpu.PrefetchScalarGridSpec(
        num_scalar_prefetch=0,
        grid=(1,),
        in_specs=[full(local_prompts_flat), full(centroids),
                  full(w1), full(b1), full(w2), full(b2),
                  full(wb1), full(bb1), full(wb2t), full(bb2)],
        out_specs=(pl.BlockSpec((N, G), lambda i: (0, 0)),
                   pl.BlockSpec((2, G), lambda i: (0, 0))),
    )
    return pl.pallas_call(
        _agg_kernel,
        out_shape=(jax.ShapeDtypeStruct((N, G), jnp.float32),
                   jax.ShapeDtypeStruct((2, G), jnp.float32)),
        grid_spec=grid_spec,
    )(local_prompts_flat, centroids, w1, b1, w2, b2, wb1, bb1, wb2t, bb2)


# ----------------------------------------------------------------------------
# Parameter init (deterministic, PyTorch-Linear-style uniform(-1/sqrt(in), ..)).
# Weights stored (in, out) so the kernel computes x @ W + b.
# ----------------------------------------------------------------------------
def _init_linear(key, fan_in, fan_out):
    kw, kb = jax.random.split(key)
    bound = 1.0 / math.sqrt(fan_in)
    w = jax.random.uniform(kw, (fan_in, fan_out), jnp.float32, -bound, bound)
    b = jax.random.uniform(kb, (1, fan_out), jnp.float32, -bound, bound)
    return w, b


def init_params(key, prompt_dim, n_hidden):
    k1, k2, k3, k4 = jax.random.split(key, 4)
    w1, b1 = _init_linear(k1, prompt_dim, n_hidden)     # cov_net layer 1
    w2, b2 = _init_linear(k2, n_hidden, prompt_dim)     # cov_net layer 2
    wb1, bb1 = _init_linear(k3, prompt_dim, n_hidden)   # bernoulli_net layer 1
    wb2, bb2 = _init_linear(k4, n_hidden, 1)            # bernoulli_net layer 2
    return (w1, b1, w2, b2, wb1, bb1, wb2, bb2)


# ----------------------------------------------------------------------------
# Forward pass of NonparametricAgg.
# ----------------------------------------------------------------------------
def nonparametric_agg_forward(local_prompts, params, outer_loop=10, seed=0):
    n_clients, n_local, prompt_dim = local_prompts.shape
    n_global = n_clients * n_local

    # z initialization (torch code uses unseeded np.random.shuffle; seeded here
    # for determinism).
    rng = np.random.default_rng(seed)
    z = []
    for _ in range(n_clients):
        perm = rng.permutation(n_global)
        zi = np.zeros((n_local, n_global), dtype=np.float32)
        zi[np.arange(n_local), perm[:n_local]] = 1.0
        z.append(zi)

    centroids = local_prompts.reshape(n_global, prompt_dim)

    # TODO(synk): the reference forward() also runs Adam gradient steps on
    # cov_net / bernoulli_net / centroids each inner iteration; autodiff through
    # the Pallas kernel + an in-forward optimizer has no clean kernel
    # equivalent, so parameters/centroids are held fixed and only the
    # z-assignment updates are performed.  With them fixed, m1 and the
    # Bernoulli log-probs are loop-invariant, so they are computed once in a
    # single kernel call and the loop below is pure host numpy.
    m_flat, b_tab = compute_likelihood_tables(
        local_prompts.reshape(n_global, prompt_dim), centroids, params)
    m_all = np.asarray(m_flat).reshape(n_clients, n_local, n_global)
    b_tab = np.asarray(b_tab)                  # (2, n_global)
    logp, log1mp = b_tab[0], b_tab[1]

    # Exact max-weight assignment (replacement for scipy linear_sum_assignment
    # with maximize=True); vectorized brute force over all permutations is
    # exact and dependency-free at these small sizes.
    perms = np.array(list(permutations(range(n_global), n_local)), dtype=np.int64)
    rows = np.arange(n_local)

    # Torch broadcasts value (n_local,) against probs (1,1) and Independent
    # sums the size-n_local broadcast dim -> factor n_local on the scalar
    # Bernoulli log-prob.
    L = float(n_local)
    for _ in range(outer_loop):
        for t in range(n_clients):
            c = z[t].sum(axis=0)                              # (n_global,)
            bern = L * (c * logp + (1.0 - c) * log1mp)        # (n_global,)
            m = m_all[t] + bern[None, :]                      # (n_local, n_global)
            scores = m[rows[None, :], perms].sum(axis=1)      # (n_perms,)
            best_cols = perms[int(np.argmax(scores))]
            z[t][:] = 0.0
            z[t][rows, best_cols] = 1.0

    z_sum = np.stack(z).sum(axis=(0, 1))                      # (n_global,)
    sel = np.where(z_sum > 0)[0]
    global_prompts = centroids[jnp.asarray(sel)]
    return global_prompts


if __name__ == "__main__":
    key = jax.random.PRNGKey(0)
    n_clients, n_local, prompt_dim, n_hidden = 2, 4, 32, 32

    k_lp, k_p = jax.random.split(key)
    local_prompts = jax.random.normal(
        k_lp, (n_clients, n_local, prompt_dim), dtype=jnp.float32)
    params = init_params(k_p, prompt_dim, n_hidden)

    global_prompts = nonparametric_agg_forward(local_prompts, params, outer_loop=10)
    global_prompts = jax.block_until_ready(global_prompts)

    assert global_prompts.ndim == 2 and global_prompts.shape[1] == prompt_dim
    print("KERNEL_OK")
</pallas_src>

<mosaic_0001>
module attributes {stable_mosaic.version = 11 : i64} {
  func.func @_agg_kernel(%arg0: i32, %arg1: memref<8x32xf32, #tpu.memory_space<vmem>>, %arg2: memref<8x32xf32, #tpu.memory_space<vmem>>, %arg3: memref<32x32xf32, #tpu.memory_space<vmem>>, %arg4: memref<1x32xf32, #tpu.memory_space<vmem>>, %arg5: memref<32x32xf32, #tpu.memory_space<vmem>>, %arg6: memref<1x32xf32, #tpu.memory_space<vmem>>, %arg7: memref<32x32xf32, #tpu.memory_space<vmem>>, %arg8: memref<1x32xf32, #tpu.memory_space<vmem>>, %arg9: memref<1x32xf32, #tpu.memory_space<vmem>>, %arg10: memref<1x1xf32, #tpu.memory_space<vmem>>, %arg11: memref<8x8xf32, #tpu.memory_space<vmem>>, %arg12: memref<2x8xf32, #tpu.memory_space<vmem>>) attributes {dimension_semantics = [#tpu.dimension_semantics<arbitrary>], iteration_bounds = array<i64: 1>, scalar_prefetch = 0 : i64, scratch_operands = 0 : i64, tpu.core_type = #tpu.core_type<tc>, window_params = [{pipeline_mode = #tpu.pipeline_mode<synchronous>, transform_indices = @transform_0, window_bounds = array<i64: 8, 32>}, {pipeline_mode = #tpu.pipeline_mode<synchronous>, transform_indices = @transform_1, window_bounds = array<i64: 8, 32>}, {pipeline_mode = #tpu.pipeline_mode<synchronous>, transform_indices = @transform_2, window_bounds = array<i64: 32, 32>}, {pipeline_mode = #tpu.pipeline_mode<synchronous>, transform_indices = @transform_3, window_bounds = array<i64: 1, 32>}, {pipeline_mode = #tpu.pipeline_mode<synchronous>, transform_indices = @transform_4, window_bounds = array<i64: 32, 32>}, {pipeline_mode = #tpu.pipeline_mode<synchronous>, transform_indices = @transform_5, window_bounds = array<i64: 1, 32>}, {pipeline_mode = #tpu.pipeline_mode<synchronous>, transform_indices = @transform_6, window_bounds = array<i64: 32, 32>}, {pipeline_mode = #tpu.pipeline_mode<synchronous>, transform_indices = @transform_7, window_bounds = array<i64: 1, 32>}, {pipeline_mode = #tpu.pipeline_mode<synchronous>, transform_indices = @transform_8, window_bounds = array<i64: 1, 32>}, {pipeline_mode = #tpu.pipeline_mode<synchronous>, transform_indices = @transform_9, window_bounds = array<i64: 1, 1>}, {pipeline_mode = #tpu.pipeline_mode<synchronous>, transform_indices = @transform_10, window_bounds = array<i64: 8, 8>}, {pipeline_mode = #tpu.pipeline_mode<synchronous>, transform_indices = @transform_11, window_bounds = array<i64: 2, 8>}]} {
    %c0 = arith.constant 0 : index
    %c0_0 = arith.constant 0 : index
    %0 = vector.load %arg1[%c0, %c0_0] : memref<8x32xf32, #tpu.memory_space<vmem>>, vector<8x32xf32>
    %c0_1 = arith.constant 0 : index
    %c0_2 = arith.constant 0 : index
    %1 = vector.load %arg2[%c0_1, %c0_2] : memref<8x32xf32, #tpu.memory_space<vmem>>, vector<8x32xf32>
    %c0_3 = arith.constant 0 : index
    %c0_4 = arith.constant 0 : index
    %2 = vector.load %arg3[%c0_3, %c0_4] : memref<32x32xf32, #tpu.memory_space<vmem>>, vector<32x32xf32>
    %cst = arith.constant dense<0.000000e+00> : vector<8x32xf32>
    %3 = tpu.matmul %1, %2, %cst {dimension_numbers = #tpu.dot_dimension_numbers<[1], [0], [0], [1], [0, 0, 1, 1], [], []>} : vector<8x32xf32>, vector<32x32xf32>, vector<8x32xf32> -> vector<8x32xf32>
    %c0_5 = arith.constant 0 : index
    %c0_6 = arith.constant 0 : index
    %4 = vector.load %arg4[%c0_5, %c0_6] : memref<1x32xf32, #tpu.memory_space<vmem>>, vector<1x32xf32>
    %5 = vector.broadcast %4 : vector<1x32xf32> to vector<8x32xf32>
    %6 = arith.addf %3, %5 : vector<8x32xf32>
    %cst_7 = arith.constant 0.000000e+00 : f32
    %7 = vector.broadcast %cst_7 : f32 to vector<8x32xf32>
    %8 = arith.maximumf %6, %7 : vector<8x32xf32>
    %c0_8 = arith.constant 0 : index
    %c0_9 = arith.constant 0 : index
    %9 = vector.load %arg5[%c0_8, %c0_9] : memref<32x32xf32, #tpu.memory_space<vmem>>, vector<32x32xf32>
    %cst_10 = arith.constant dense<0.000000e+00> : vector<8x32xf32>
    %10 = tpu.matmul %8, %9, %cst_10 {dimension_numbers = #tpu.dot_dimension_numbers<[1], [0], [0], [1], [0, 0, 1, 1], [], []>} : vector<8x32xf32>, vector<32x32xf32>, vector<8x32xf32> -> vector<8x32xf32>
    %c0_11 = arith.constant 0 : index
    %c0_12 = arith.constant 0 : index
    %11 = vector.load %arg6[%c0_11, %c0_12] : memref<1x32xf32, #tpu.memory_space<vmem>>, vector<1x32xf32>
    %12 = vector.broadcast %11 : vector<1x32xf32> to vector<8x32xf32>
    %13 = arith.addf %10, %12 : vector<8x32xf32>
    %cst_13 = arith.constant 0.000000e+00 : f32
    %14 = vector.broadcast %cst_13 : f32 to vector<8x32xf32>
    %15 = arith.subf %14, %13 : vector<8x32xf32>
    %cst_14 = arith.constant 0.000000e+00 : f32
    %16 = vector.broadcast %cst_14 : f32 to vector<8x32xf32>
    %17 = arith.maximumf %15, %16 : vector<8x32xf32>
    %18 = vector.broadcast %cst_14 : f32 to vector<8x32xf32>
    %19 = arith.subf %15, %18 : vector<8x32xf32>
    %20 = arith.cmpf one, %19, %19 : vector<8x32xf32>
    %21 = vector.broadcast %cst_14 : f32 to vector<8x32xf32>
    %22 = arith.addf %15, %21 : vector<8x32xf32>
    %23 = math.absf %19 : vector<8x32xf32>
    %cst_15 = arith.constant 0.000000e+00 : f32
    %24 = vector.broadcast %cst_15 : f32 to vector<8x32xf32>
    %25 = arith.subf %24, %23 : vector<8x32xf32>
    %26 = math.exp %25 : vector<8x32xf32>
    %27 = math.log1p %26 : vector<8x32xf32>
    %28 = arith.addf %17, %27 : vector<8x32xf32>
    %29 = arith.select %20, %22, %28 : vector<8x32xi1>, vector<8x32xf32>
    %cst_16 = arith.constant 0.000000e+00 : f32
    %30 = vector.broadcast %cst_16 : f32 to vector<8x32xf32>
    %31 = arith.subf %30, %29 : vector<8x32xf32>
    %cst_17 = arith.constant -4.000000e+01 : f32
    %32 = vector.broadcast %cst_17 : f32 to vector<8x32xf32>
    %33 = arith.maximumf %31, %32 : vector<8x32xf32>
    %cst_18 = arith.constant -2.000000e+00 : f32
    %34 = vector.broadcast %cst_18 : f32 to vector<8x32xf32>
    %35 = arith.mulf %34, %33 : vector<8x32xf32>
    %36 = math.exp %35 : vector<8x32xf32>
    %37 = arith.mulf %0, %0 : vector<8x32xf32>
    %cst_19 = arith.constant dense<0.000000e+00> : vector<8x8xf32>
    %38 = tpu.matmul %37, %36, %cst_19 {dimension_numbers = #tpu.dot_dimension_numbers<[1], [1], [0], [0], [0, 0, 1, 0], [], []>} : vector<8x32xf32>, vector<8x32xf32>, vector<8x8xf32> -> vector<8x8xf32>
    %39 = arith.mulf %36, %1 : vector<8x32xf32>
    %cst_20 = arith.constant dense<0.000000e+00> : vector<8x8xf32>
    %40 = tpu.matmul %0, %39, %cst_20 {dimension_numbers = #tpu.dot_dimension_numbers<[1], [1], [0], [0], [0, 0, 1, 0], [], []>} : vector<8x32xf32>, vector<8x32xf32>, vector<8x8xf32> -> vector<8x8xf32>
    %cst_21 = arith.constant -5.000000e-01 : f32
    %41 = vector.broadcast %cst_21 : f32 to vector<8x32xf32>
    %42 = arith.mulf %41, %36 : vector<8x32xf32>
    %43 = arith.mulf %42, %1 : vector<8x32xf32>
    %44 = arith.mulf %43, %1 : vector<8x32xf32>
    %45 = arith.subf %44, %33 : vector<8x32xf32>
    %cst_22 = arith.constant 1.000000e+00 : f32
    %46 = vector.broadcast %cst_22 : f32 to vector<1x32xf32>
    %cst_23 = arith.constant dense<0.000000e+00> : vector<1x8xf32>
    %47 = tpu.matmul %46, %45, %cst_23 {dimension_numbers = #tpu.dot_dimension_numbers<[1], [1], [0], [0], [0, 0, 1, 0], [], []>} : vector<1x32xf32>, vector<8x32xf32>, vector<1x8xf32> -> vector<1x8xf32>
    %cst_24 = arith.constant -5.000000e-01 : f32
    %48 = vector.broadcast %cst_24 : f32 to vector<8x8xf32>
    %49 = arith.mulf %48, %38 : vector<8x8xf32>
    %50 = arith.addf %49, %40 : vector<8x8xf32>
    %51 = vector.broadcast %47 : vector<1x8xf32> to vector<8x8xf32>
    %52 = arith.addf %50, %51 : vector<8x8xf32>
    %cst_25 = arith.constant 29.4060326 : f32
    %53 = vector.broadcast %cst_25 : f32 to vector<8x8xf32>
    %54 = arith.subf %52, %53 : vector<8x8xf32>
    %c0_26 = arith.constant 0 : index
    %c0_27 = arith.constant 0 : index
    %55 = vector.load %arg11[%c0_26, %c0_27] : memref<8x8xf32, #tpu.memory_space<vmem>>, vector<8x8xf32>
    tpu.vector_store %arg11[%c0_26, %c0_27], %54 {strides = array<i32>} : memref<8x8xf32, #tpu.memory_space<vmem>>, vector<8x8xf32>,
    %c0_28 = arith.constant 0 : index
    %c0_29 = arith.constant 0 : index
    %56 = vector.load %arg7[%c0_28, %c0_29] : memref<32x32xf32, #tpu.memory_space<vmem>>, vector<32x32xf32>
    %cst_30 = arith.constant dense<0.000000e+00> : vector<8x32xf32>
    %57 = tpu.matmul %1, %56, %cst_30 {dimension_numbers = #tpu.dot_dimension_numbers<[1], [0], [0], [1], [0, 0, 1, 1], [], []>} : vector<8x32xf32>, vector<32x32xf32>, vector<8x32xf32> -> vector<8x32xf32>
    %c0_31 = arith.constant 0 : index
    %c0_32 = arith.constant 0 : index
    %58 = vector.load %arg8[%c0_31, %c0_32] : memref<1x32xf32, #tpu.memory_space<vmem>>, vector<1x32xf32>
    %59 = vector.broadcast %58 : vector<1x32xf32> to vector<8x32xf32>
    %60 = arith.addf %57, %59 : vector<8x32xf32>
    %cst_33 = arith.constant 0.000000e+00 : f32
    %61 = vector.broadcast %cst_33 : f32 to vector<8x32xf32>
    %62 = arith.maximumf %60, %61 : vector<8x32xf32>
    %c0_34 = arith.constant 0 : index
    %c0_35 = arith.constant 0 : index
    %63 = vector.load %arg9[%c0_34, %c0_35] : memref<1x32xf32, #tpu.memory_space<vmem>>, vector<1x32xf32>
    %cst_36 = arith.constant dense<0.000000e+00> : vector<1x8xf32>
    %64 = tpu.matmul %63, %62, %cst_36 {dimension_numbers = #tpu.dot_dimension_numbers<[1], [1], [0], [0], [0, 0, 1, 0], [], []>} : vector<1x32xf32>, vector<8x32xf32>, vector<1x8xf32> -> vector<1x8xf32>
    %c0_37 = arith.constant 0 : index
    %c0_38 = arith.constant 0 : index
    %65 = vector.load %arg10[%c0_37, %c0_38] : memref<1x1xf32, #tpu.memory_space<vmem>>, vector<1x1xf32>
    %66 = vector.broadcast %65 : vector<1x1xf32> to vector<1x8xf32>
    %67 = arith.addf %64, %66 : vector<1x8xf32>
    %cst_39 = arith.constant 0.000000e+00 : f32
    %68 = vector.broadcast %cst_39 : f32 to vector<1x8xf32>
    %69 = arith.subf %68, %67 : vector<1x8xf32>
    %cst_40 = arith.constant 0.000000e+00 : f32
    %70 = vector.broadcast %cst_40 : f32 to vector<1x8xf32>
    %71 = arith.maximumf %69, %70 : vector<1x8xf32>
    %72 = vector.broadcast %cst_40 : f32 to vector<1x8xf32>
    %73 = arith.subf %69, %72 : vector<1x8xf32>
    %74 = arith.cmpf one, %73, %73 : vector<1x8xf32>
    %75 = vector.broadcast %cst_40 : f32 to vector<1x8xf32>
    %76 = arith.addf %69, %75 : vector<1x8xf32>
    %77 = math.absf %73 : vector<1x8xf32>
    %cst_41 = arith.constant 0.000000e+00 : f32
    %78 = vector.broadcast %cst_41 : f32 to vector<1x8xf32>
    %79 = arith.subf %78, %77 : vector<1x8xf32>
    %80 = math.exp %79 : vector<1x8xf32>
    %81 = math.log1p %80 : vector<1x8xf32>
    %82 = arith.addf %71, %81 : vector<1x8xf32>
    %83 = arith.select %74, %76, %82 : vector<1x8xi1>, vector<1x8xf32>
    %cst_42 = arith.constant 0.000000e+00 : f32
    %84 = vector.broadcast %cst_42 : f32 to vector<1x8xf32>
    %85 = arith.subf %84, %83 : vector<1x8xf32>
    %c0_43 = arith.constant 0 : index
    %c0_44 = arith.constant 0 : index
    %86 = vector.load %arg12[%c0_43, %c0_44] : memref<2x8xf32, #tpu.memory_space<vmem>>, vector<1x8xf32>
    tpu.vector_store %arg12[%c0_43, %c0_44], %85 {strides = array<i32>} : memref<2x8xf32, #tpu.memory_space<vmem>>, vector<1x8xf32>,
    %cst_45 = arith.constant 0.000000e+00 : f32
    %87 = vector.broadcast %cst_45 : f32 to vector<1x8xf32>
    %88 = arith.maximumf %67, %87 : vector<1x8xf32>
    %89 = vector.broadcast %cst_45 : f32 to vector<1x8xf32>
    %90 = arith.subf %67, %89 : vector<1x8xf32>
    %91 = arith.cmpf one, %90, %90 : vector<1x8xf32>
    %92 = vector.broadcast %cst_45 : f32 to vector<1x8xf32>
    %93 = arith.addf %67, %92 : vector<1x8xf32>
    %94 = math.absf %90 : vector<1x8xf32>
    %cst_46 = arith.constant 0.000000e+00 : f32
    %95 = vector.broadcast %cst_46 : f32 to vector<1x8xf32>
    %96 = arith.subf %95, %94 : vector<1x8xf32>
    %97 = math.exp %96 : vector<1x8xf32>
    %98 = math.log1p %97 : vector<1x8xf32>
    %99 = arith.addf %88, %98 : vector<1x8xf32>
    %100 = arith.select %91, %93, %99 : vector<1x8xi1>, vector<1x8xf32>
    %cst_47 = arith.constant 0.000000e+00 : f32
    %101 = vector.broadcast %cst_47 : f32 to vector<1x8xf32>
    %102 = arith.subf %101, %100 : vector<1x8xf32>
    %c1 = arith.constant 1 : index
    %c0_48 = arith.constant 0 : index
    %103 = vector.load %arg12[%c1, %c0_48] : memref<2x8xf32, #tpu.memory_space<vmem>>, vector<1x8xf32>
    tpu.vector_store %arg12[%c1, %c0_48], %102 {strides = array<i32>} : memref<2x8xf32, #tpu.memory_space<vmem>>, vector<1x8xf32>,
    return
  }
  func.func @transform_0(%arg0: i32) -> (i32, i32) {
    %c0_i32 = arith.constant 0 : i32
    %c0_i32_0 = arith.constant 0 : i32
    %c0_i32_1 = arith.constant 0 : i32
    return %c0_i32, %c0_i32_0 : i32, i32
  }
  func.func @transform_1(%arg0: i32) -> (i32, i32) {
    %c0_i32 = arith.constant 0 : i32
    %c0_i32_0 = arith.constant 0 : i32
    %c0_i32_1 = arith.constant 0 : i32
    return %c0_i32, %c0_i32_0 : i32, i32
  }
  func.func @transform_2(%arg0: i32) -> (i32, i32) {
    %c0_i32 = arith.constant 0 : i32
    %c0_i32_0 = arith.constant 0 : i32
    %c0_i32_1 = arith.constant 0 : i32
    return %c0_i32, %c0_i32_0 : i32, i32
  }
  func.func @transform_3(%arg0: i32) -> (i32, i32) {
    %c0_i32 = arith.constant 0 : i32
    %c0_i32_0 = arith.constant 0 : i32
    %c0_i32_1 = arith.constant 0 : i32
    return %c0_i32, %c0_i32_0 : i32, i32
  }
  func.func @transform_4(%arg0: i32) -> (i32, i32) {
    %c0_i32 = arith.constant 0 : i32
    %c0_i32_0 = arith.constant 0 : i32
    %c0_i32_1 = arith.constant 0 : i32
    return %c0_i32, %c0_i32_0 : i32, i32
  }
  func.func @transform_5(%arg0: i32) -> (i32, i32) {
    %c0_i32 = arith.constant 0 : i32
    %c0_i32_0 = arith.constant 0 : i32
    %c0_i32_1 = arith.constant 0 : i32
    return %c0_i32, %c0_i32_0 : i32, i32
  }
  func.func @transform_6(%arg0: i32) -> (i32, i32) {
    %c0_i32 = arith.constant 0 : i32
    %c0_i32_0 = arith.constant 0 : i32
    %c0_i32_1 = arith.constant 0 : i32
    return %c0_i32, %c0_i32_0 : i32, i32
  }
  func.func @transform_7(%arg0: i32) -> (i32, i32) {
    %c0_i32 = arith.constant 0 : i32
    %c0_i32_0 = arith.constant 0 : i32
    %c0_i32_1 = arith.constant 0 : i32
    return %c0_i32, %c0_i32_0 : i32, i32
  }
  func.func @transform_8(%arg0: i32) -> (i32, i32) {
    %c0_i32 = arith.constant 0 : i32
    %c0_i32_0 = arith.constant 0 : i32
    %c0_i32_1 = arith.constant 0 : i32
    return %c0_i32, %c0_i32_0 : i32, i32
  }
  func.func @transform_9(%arg0: i32) -> (i32, i32) {
    %c0_i32 = arith.constant 0 : i32
    %c0_i32_0 = arith.constant 0 : i32
    %c0_i32_1 = arith.constant 0 : i32
    return %c0_i32, %c0_i32_0 : i32, i32
  }
  func.func @transform_10(%arg0: i32) -> (i32, i32) {
    %c0_i32 = arith.constant 0 : i32
    %c0_i32_0 = arith.constant 0 : i32
    %c0_i32_1 = arith.constant 0 : i32
    return %c0_i32, %c0_i32_0 : i32, i32
  }
  func.func @transform_11(%arg0: i32) -> (i32, i32) {
    %c0_i32 = arith.constant 0 : i32
    %c0_i32_0 = arith.constant 0 : i32
    %c0_i32_1 = arith.constant 0 : i32
    return %c0_i32, %c0_i32_0 : i32, i32
  }
}

</mosaic_0001>

<bundles_post_ra>
// kernel: compute_likelihood_tables.1
= control target key start
LH: loop header
LB: loop body
LE: loop exit
PB: predicated region body
PF: predicated region fallthrough
CT: control target
= control target key end

     0   :  { %s780_s0 = inlined_call_operand.hbm [shape: f32[8,32], index: 0, kind: input, shape index: {}]   ;;  %s781_s1 = inlined_call_operand.hbm [shape: f32[8,32], index: 1, kind: input, shape index: {}]   ;;  %s782_s2 = inlined_call_operand.hbm [shape: f32[32,32], index: 2, kind: input, shape index: {}]   ;;  %s783_s3 = inlined_call_operand.vmem [shape: f32[1,32], index: 3, kind: input, shape index: {}]   ;;  %s784_s4 = inlined_call_operand.hbm [shape: f32[32,32], index: 4, kind: input, shape index: {}]   ;;  %s785_s5 = inlined_call_operand.vmem [shape: f32[1,32], index: 5, kind: input, shape index: {}]   ;;  %s786_s6 = inlined_call_operand.hbm [shape: f32[32,32], index: 6, kind: input, shape index: {}]   ;;  %s787_s7 = inlined_call_operand.vmem [shape: f32[1,32], index: 7, kind: input, shape index: {}]   ;;  %s788_s8 = inlined_call_operand.vmem [shape: f32[1,32], index: 8, kind: input, shape index: {}]   ;;  %s789_s9 = inlined_call_operand.<no memory space> [shape: f32[1,1], index: 9, kind: input, shape index: {}]   ;;  %s790_s10 = inlined_call_operand.hbm [shape: f32[8,8], index: 10, kind: output, shape index: {0}]   ;;  %s791_s11 = inlined_call_operand.hbm [shape: f32[2,8], index: 11, kind: output, shape index: {1}]  }
   0x1   :  { %v17_v0 = vstv %s789_s9 }
   0x2   :  { %18 = vst [vmem:[#allocation2] sm:$0x1] %v17_v0 }
   0x3   :  { %19 = vsyncpa [#allocation4], 0 }
   0x4   :  { %20 = vsyncpa [#allocation7], 0 }
   0x5   :  { %21 = vsyncpa [#allocation10], 0 }
   0x6   :  { %22 = vsyncpa [#allocation5], 0  ;;  %s40_s21 = sshll.u32 %s781_s1, 4  ;;  %s41_s21 = int_to_ptr.hbm [resolvable:$true] %s40_s21 }
   0x7   :  { %23 = vsyncpa [#allocation14], 0  ;;  %s655_s22 = smov [#allocation6]   ;;  %s65_s26 = sshll.u32 %s784_s4, 4  ;;  %s66_s26 = int_to_ptr.hbm [resolvable:$true] %s65_s26 }
   0x8   :  { %s42_s23 = sshll.u32 %s655_s22, 4  ;;  %s656_s9 = smov [#allocation9]   ;;  %s43_s23 = int_to_ptr.vmem [resolvable:$true] %s42_s23 }
   0x9   :  { %45 = dma.hbm_to_vmem [thread:$0]  %s41_s21, 128, %s43_s23, [#allocation7]  }
   0xa   :  { %s67_s27 = sshll.u32 %s656_s9, 4  ;;  %s29_s30 = sshll.u32 %s780_s0, 4  ;;  %s68_s27 = int_to_ptr.vmem [resolvable:$true] %s67_s27  ;;  %s30_s30 = int_to_ptr.hbm [resolvable:$true] %s29_s30 }
   0xb   :  { %s657_s1 = smov 128   ;;  %s658_s12 = smov 8  }
   0xc   :  { %73 = dma.hbm_to_vmem [thread:$0]  %s66_s26, 512, %s68_s27, [#allocation10], %s657_s1, %s657_s1, %s658_s12  }
   0xd   :  { %s50_s15 = sshll.u32 %s782_s2, 4  ;;  %s659_s16 = smov [#allocation3]   ;;  %s51_s15 = int_to_ptr.hbm [resolvable:$true] %s50_s15 }
   0xe   :  { %s31_s17 = sshll.u32 %s659_s16, 4  ;;  %s660_s4 = smov [#allocation8]   ;;  %s32_s17 = int_to_ptr.vmem [resolvable:$true] %s31_s17 }
   0xf   :  { %34 = dma.hbm_to_vmem [thread:$0]  %s30_s30, 128, %s32_s17, [#allocation4]  }
  0x10   :  { %s52_s18 = sshll.u32 %s660_s4, 4  ;;  %s80_s0 = sshll.u32 %s786_s6, 4  ;;  %s53_s18 = int_to_ptr.vmem [resolvable:$true] %s52_s18  ;;  %s81_s0 = int_to_ptr.hbm [resolvable:$true] %s80_s0 }
  0x11   :  { %58 = dma.hbm_to_vmem [thread:$0]  %s51_s15, 512, %s53_s18, [#allocation7], %s657_s1, %s657_s1, %s658_s12  }
  0x12   :  { %s661_s21 = smov [#allocation11]  }
  0x13   :  { %s82_s22 = sshll.u32 %s661_s21, 4  ;;  %s83_s22 = int_to_ptr.vmem [resolvable:$true] %s82_s22 }
  0x14   :  { %88 = dma.hbm_to_vmem [thread:$0]  %s81_s0, 512, %s83_s22, [#allocation10], %s657_s1, %s657_s1, %s658_s12  }
  0x15   :  { %645 = dma.done.wait [#allocation4], 128  }
  0x16   :  { %646 = vsyncadd [#allocation4], 4294967168 }
  0x17   :  { %647 = dma.done.wait [#allocation7], 640  }
  0x18   :  { %648 = vsyncadd [#allocation7], 4294966656 }
  0x19   :  { %649 = dma.done.wait [#allocation10], 1024  }
  0x1a   :  { %650 = vsyncadd [#allocation10], 4294966272  ;;  %v120_v1 = vld [vmem:[#allocation8 + $0x18] sm:$0xff]  ;;  %v119_v2 = vld [vmem:[#allocation8 + $0x10] sm:$0xff]  ;;  %vm125_vm0 = vcmask 261120   ;;  %v662_v49 = vmov 1.0  }
  0x1b   :  { %141 = vmatpush.msra.mxu0 %v120_v1  ;;  %v153_v3 = vld [vmem:[#allocation9 + $0x18] sm:$0xff]  ;;  %v118_v4 = vld [vmem:[#allocation8 + $0x8] sm:$0xff]  ;;  %v117_v5 = vld [vmem:[#allocation8] sm:$0xff]  ;;  %v663_v51 = vmov 0   ;;  %vm294_vm3 = vcmask 64512   ;;  %s408_s27 = sshll.u32 %s790_s10, 4  ;;  %s409_s27 = int_to_ptr.hbm [resolvable:$true] %s408_s27 }
  0x1c   :  { %173 = vmatpush.msra.mxu1 %v153_v3  ;;  %v744_v6 = vld [vmem:[#allocation6] sm:$0xff]  ;;  %v152_v7 = vld [vmem:[#allocation9 + $0x10] sm:$0xff]  ;;  %v151_v8 = vld [vmem:[#allocation9 + $0x8] sm:$0xff]  ;;  %459 = vset.pattern.permute.xlu0 %v663_v51  ;;  %s664_s28 = smov [#allocation12]   ;;  %vm379_vm7 = vcmask 57344   ;;  %s419_s12 = sshll.u32 %s791_s11, 4  ;;  %s420_s12 = int_to_ptr.hbm [resolvable:$true] %s419_s12 }
  0x1d   :  { %142 = vmatpush.msra.mxu0 %v119_v2  ;;  %v150_v9 = vld [vmem:[#allocation9] sm:$0xff]  ;;  %v460_v10 = vld [vmem:[%s783_s3] ss:$0 sm:$0xff]  ;;  %v115_v37 = vld [vmem:[#allocation3] sm:$0xff]  ;;  %s406_s29 = sshll.u32 %s664_s28, 4  ;;  %s407_s29 = int_to_ptr.vmem [resolvable:$true] %s406_s29 }
  0x1e   :  { %174 = vmatpush.msra.mxu1 %v152_v7  ;;  %v461_v14 = vld [vmem:[%s785_s5] ss:$0 sm:$0xff]  ;;  %v205_v39 = vmul.f32 %v115_v37, %v115_v37  ;;  %v299_v41 = vld [vmem:[#allocation11 + $0x18] sm:$0xff]  ;;  %v298_v44 = vld [vmem:[#allocation11 + $0x10] sm:$0xff] }
  0x1f   :  { %143 = vmatpush.msra.mxu0 %v118_v4  ;;  %v297_v46 = vld [vmem:[#allocation11 + $0x8] sm:$0xff]  ;;  %v296_v48 = vld [vmem:[#allocation11] sm:$0xff] }
  0x20   :  { %175 = vmatpush.msra.mxu1 %v151_v8  ;;  %v326_v50 = vld [vmem:[#allocation2] sm:$0x1] }
  0x21   :  { %144 = vmatpush.msra.mxu0 %v117_v5  ;;  %329 = vperm.xlu0 %459, %v326_v50   ;;  %v462_v55 = vld [vmem:[%s787_s7] ss:$0 sm:$0xff] }
  0x22   :  { %436 = vmatmul.msk.f32.vlgmr.msra.gmra.mxu0 %vm125_vm0, %v744_v6  ;;  %176 = vmatpush.msra.mxu1 %v150_v9  ;;  %v325_v0 = vld [vmem:[%s788_s8] sm:$0x1]  ;;  %s665_s8 = smov [#allocation13]  }
  0x23   :  { %s417_s10 = sshll.u32 %s665_s8, 4  ;;  %s418_s10 = int_to_ptr.vmem [resolvable:$true] %s417_s10 }
  0x93   :  { %v330_v1 = vpop.permute.xlu0 %329 }
  0x94   :  { %v332_v2 = vperm.slane %v330_v1, 0 }
  0x9f   :  { %v146_v11 = vpop.f32.mrf.mxu0 }
  0xa0   :  { %v147_v12 = vadd.f32 %v460_v10, %v146_v11 }
  0xa2   :  { %v149_v13 = vmax.f32 %v147_v12, 0.0 }
  0xa4   :  { %437 = vmatmul.msk.f32.vlgmr.msra.gmra.mxu1 %vm125_vm0, %v149_v13 }
 0x121   :  { %v178_v15 = vpop.f32.mrf.mxu1 }
 0x122   :  { %v179_v16 = vadd.f32 %v461_v14, %v178_v15 }
 0x124   :  { %v181_v17 = vsub.f32 0.0, %v179_v16 }
 0x126   :  { %v185_v18 = vand.u32 2147483647, %v181_v17  ;;  %v182_v29 = vmax.f32 %v181_v17, 0.0  ;;  %vm183_vm2 = vcmp.ne.f32.partialorder %v181_v17, %v181_v17 }
 0x128   :  { %v186_v19 = vsub.f32 0.0, %v185_v18 }
 0x12a   :  { %v187_v20 = vmul.f32 1.442695, %v186_v19 }
 0x12c   :  { %463 = vpow2.f32 %v187_v20 }
 0x132   :  { %v464_v21 = vpop.eup %463 }
 0x133   :  { %v189_v22 = vadd.f32 1.0, %v464_v21  ;;  %v192_v23 = vmul.f32 -0.5, %v464_v21  ;;  %v195_v25 = vand.u32 2147483647, %v464_v21 }
 0x135   :  { %465 = vlog2.f32 %v189_v22  ;;  %v193_v24 = vadd.f32 1.0, %v192_v23  ;;  %vm196_vm1 = vcmp.lt.f32.partialorder %v195_v25, 0.0004427343 }
 0x137   :  { %v194_v28 = vmul.f32 %v464_v21, %v193_v24 }
 0x13b   :  { %v466_v26 = vpop.eup %465 }
 0x13c   :  { %v191_v27 = vmul.f32 0.6931472, %v466_v26 }
 0x13e   :  { %v197_v30 = vsel %vm196_vm1, %v194_v28, %v191_v27 }
 0x13f   :  { %v198_v31 = vadd.f32 %v197_v30, %v182_v29 }
 0x141   :  { %v199_v32 = vsel %vm183_vm2, %v181_v17, %v198_v31 }
 0x142   :  { %v200_v33 = vsub.f32 0.0, %v199_v32 }
 0x144   :  { %v201_v34 = vmax.f32 %v200_v33, -40.0 }
 0x146   :  { %v202_v35 = vmul.f32 -2.0, %v201_v34 }
 0x148   :  { %v203_v36 = vmul.f32 1.442695, %v202_v35 }
 0x14a   :  { %467 = vpow2.f32 %v203_v36 }
 0x150   :  { %v468_v38 = vpop.eup %467 }
 0x151   :  { %438 = vmatpush.xpose.msk.msra.mxu2 %vm125_vm0, %v468_v38  ;;  %v232_v40 = vmul.f32 %v468_v38, %v744_v6  ;;  %v259_v42 = vmul.f32 -0.5, %v468_v38 }
 0x153   :  { %440 = vmatpush.xpose.msk.msra.mxu3 %vm125_vm0, %v232_v40  ;;  %v260_v43 = vmul.f32 %v259_v42, %v744_v6 }
 0x154   :  { %439 = vmatmul.msk.f32.vlgmr.msra.gmra.mxu2 %vm125_vm0, %v205_v39 }
 0x155   :  { %v261_v45 = vmul.f32 %v260_v43, %v744_v6 }
 0x156   :  { %441 = vmatmul.msk.f32.vlgmr.msra.gmra.mxu3 %vm125_vm0, %v115_v37 }
 0x157   :  { %316 = vmatpush.msrb.mxu3 %v299_v41  ;;  %v262_v47 = vsub.f32 %v261_v45, %v201_v34 }
 0x159   :  { %317 = vmatpush.msrb.mxu3 %v298_v44  ;;  %442 = vmatpush.xpose.msk.msrb.mxu2 %vm125_vm0, %v262_v47 }
 0x15b   :  { %318 = vmatpush.msrb.mxu3 %v297_v46 }
 0x15c   :  { %443 = vmatmul.msk.f32.vlgmr.msrb.gmra.mxu2 %vm125_vm0, %v662_v49 }
 0x15d   :  { %319 = vmatpush.msrb.mxu3 %v296_v48 }
 0x15e   :  { %445 = vmatmul.msk.f32.vlgmr.msrb.gmra.mxu3 %vm125_vm0, %v744_v6 }
 0x1d7   :  { %v229_v52 = vpop.f32.mrf.mxu2 }
 0x1d8   :  { %v289_v54 = vmul.f32 -0.5, %v229_v52 }
 0x1d9   :  { %v256_v53 = vpop.f32.mrf.mxu3 }
 0x1da   :  { %v290_v57 = vadd.f32 %v289_v54, %v256_v53 }
 0x1df   :  { %v286_v56 = vpop.f32.mrf.mxu2 }
 0x1e0   :  { %v291_v58 = vperm.slane %v286_v56, 0 }
 0x1e1   :  { %v321_v59 = vpop.f32.mrf.mxu3 }
 0x1e2   :  { %v292_v60 = vadd.f32 %v291_v58, %v290_v57  ;;  %v322_v61 = vadd.f32 %v462_v55, %v321_v59 }
 0x1e4   :  { %v444_v62 = vadd.f32 -29.406033, %v292_v60  ;;  %v324_v63 = vmax.f32 %v322_v61, 0.0 }
 0x1e6   :  { %446 = vmatpush.xpose.msk.msrb.mxu0 %vm125_vm0, %v324_v63  ;;  %295 = vst.msk [vmem:[#allocation12] sm:$0xff] %vm294_vm3, %v444_v62 }
 0x1e7   :  { %411 = dma.vmem_to_hbm [thread:$0]  %s407_s29, 128, %s409_s27, [#allocation5]  }
 0x1e9   :  { %447 = vmatmul.msk.f32.vlgmr.msrb.gmra.mxu0 %vm125_vm0, %v325_v0 }
 0x266   :  { %v356_v3 = vpop.f32.mrf.mxu0 }
 0x267   :  { %v357_v4 = vadd.f32 %v356_v3, %v332_v2 }
 0x269   :  { %v359_v5 = vsub.f32 0.0, %v357_v4  ;;  %v384_v6 = vand.u32 2147483647, %v357_v4  ;;  %v381_v26 = vmax.f32 %v357_v4, 0.0  ;;  %vm382_vm6 = vcmp.ne.f32.partialorder %v357_v4, %v357_v4 }
 0x26b   :  { %v363_v7 = vand.u32 2147483647, %v359_v5  ;;  %v385_v8 = vsub.f32 0.0, %v384_v6  ;;  %v360_v30 = vmax.f32 %v359_v5, 0.0  ;;  %vm361_vm8 = vcmp.ne.f32.partialorder %v359_v5, %v359_v5 }
 0x26d   :  { %v364_v9 = vsub.f32 0.0, %v363_v7  ;;  %v386_v10 = vmul.f32 1.442695, %v385_v8 }
 0x26f   :  { %v365_v11 = vmul.f32 1.442695, %v364_v9  ;;  %469 = vpow2.f32 %v386_v10 }
 0x271   :  { %471 = vpow2.f32 %v365_v11 }
 0x275   :  { %v470_v12 = vpop.eup %469 }
 0x276   :  { %v388_v13 = vadd.f32 1.0, %v470_v12  ;;  %v391_v15 = vmul.f32 -0.5, %v470_v12  ;;  %v394_v19 = vand.u32 2147483647, %v470_v12 }
 0x277   :  { %v472_v14 = vpop.eup %471 }
 0x278   :  { %v367_v16 = vadd.f32 1.0, %v472_v14  ;;  %473 = vlog2.f32 %v388_v13  ;;  %v370_v17 = vmul.f32 -0.5, %v472_v14  ;;  %v392_v18 = vadd.f32 1.0, %v391_v15 }
 0x279   :  { %v373_v22 = vand.u32 2147483647, %v472_v14  ;;  %vm395_vm4 = vcmp.lt.f32.partialorder %v394_v19, 0.0004427343 }
 0x27a   :  { %475 = vlog2.f32 %v367_v16  ;;  %v371_v20 = vadd.f32 1.0, %v370_v17  ;;  %v393_v24 = vmul.f32 %v470_v12, %v392_v18 }
 0x27b   :  { %vm374_vm5 = vcmp.lt.f32.partialorder %v373_v22, 0.0004427343 }
 0x27c   :  { %v372_v28 = vmul.f32 %v472_v14, %v371_v20 }
 0x27e   :  { %v474_v21 = vpop.eup %473 }
 0x27f   :  { %v390_v23 = vmul.f32 0.6931472, %v474_v21 }
 0x280   :  { %v476_v25 = vpop.eup %475 }
 0x281   :  { %v369_v27 = vmul.f32 0.6931472, %v476_v25  ;;  %v396_v29 = vsel %vm395_vm4, %v393_v24, %v390_v23 }
 0x282   :  { %v397_v31 = vadd.f32 %v396_v29, %v381_v26 }
 0x283   :  { %v375_v32 = vsel %vm374_vm5, %v372_v28, %v369_v27 }
 0x284   :  { %v376_v33 = vadd.f32 %v375_v32, %v360_v30  ;;  %v398_v34 = vsel %vm382_vm6, %v357_v4, %v397_v31 }
 0x285   :  { %v399_v35 = vsub.f32 0.0, %v398_v34 }
 0x286   :  { %v377_v36 = vsel %vm361_vm8, %v359_v5, %v376_v33 }
 0x287   :  { %v378_v37 = vsub.f32 0.0, %v377_v36  ;;  %400 = vst.msk [vmem:[#allocation13 + $0x1] sm:$0x1] %vm379_vm7, %v399_v35 }
 0x289   :  { %380 = vst.msk [vmem:[#allocation13] sm:$0x1] %vm379_vm7, %v378_v37 }
 0x28a   :  { %422 = dma.vmem_to_hbm [thread:$0]  %s418_s10, 32, %s420_s12, [#allocation14]  }
 0x28b   :  { %651 = dma.done.wait [#allocation5], 128  }
 0x28c   :  { %652 = vsyncadd [#allocation5], 4294967168 }
 0x28d   :  { %653 = dma.done.wait [#allocation14], 32  }
 0x28e   :  { %654 = vsyncadd [#allocation14], 4294967264 }
 0x28f   :  { %431 = vsyncpa [#allocation4], 1 }
 0x290   :  { %432 = vsyncpa [#allocation7], 1 }
 0x291   :  { %433 = vsyncpa [#allocation10], 1 }
 0x292   :  { %434 = vsyncpa [#allocation5], 1 }
 0x293   :  { %435 = vsyncpa [#allocation14], 1 }

</bundles_post_ra>
